<compile_context>
chip_gen: v7x
topology: tpu7x:2x2x1
jax: 0.10.0
libtpu: 0.0.40
codegen_flags: <defaults>
</compile_context>

<pallas_src>
import functools

import jax
import jax.numpy as jnp
from jax.experimental import pallas as pl
from jax.experimental.pallas import tpu as pltpu


BN_EPS = 1e-5
PAD = 128               # lane (output-feature) padding for every layer
SUB = 32                # sublane (input-feature) padding for the weight slab
N_LAYERS = 10           # 9 block linears + final projection
N_VECS = N_LAYERS + 6   # 10 biases + 3 BN gammas + 3 BN betas
OUT_DIM = 4
BN_FEATS = (10, 20, 20)


def _layer_dims(in_channel):
    """(in, out) of every Linear, in forward order."""
    return [
        (in_channel, 20), (20, 15), (15, 10),   # block 1
        (10, 20), (20, 20), (20, 20),           # block 2
        (20, 20), (20, 20), (20, 20),           # block 3
        (20, OUT_DIM),                          # final projection
    ]


# --------------------------------------------------------------------------
# Kernel: one independent batch per grid step
# --------------------------------------------------------------------------
def _blocks_kernel(x_ref, w_ref, v_ref, out_ref, *, cin8):
    """x_ref:   (1, B, cin8) f32 input batch (zero past the true in_channel)
    w_ref:   (N_LAYERS, SUB, PAD) f32 weight slab (grid-invariant, resident)
    v_ref:   (N_VECS, PAD) f32: bias[0:10], gamma[10:13], beta[13:16]
    out_ref: (1, B, PAD) f32 lane-dense output (cols >= OUT_DIM stay zero)
    """
    x = x_ref[0]                          # (B, cin8), already f32
    inv_b = 1.0 / x.shape[0]              # static batch size

    layer = 0
    for blk in range(3):
        # 3 x (Linear -> ReLU)
        for _ in range(3):
            if layer == 0:
                w = w_ref[0, :cin8, :]            # (cin8, PAD) static slice
                lhs = x                            # (B, cin8)
            else:
                w = w_ref[layer]                   # (SUB, PAD)
                lhs = x[:, :SUB]                   # pad lanes are exactly 0
            b = v_ref[pl.ds(layer, 1), :]          # (1, PAD)
            x = jnp.maximum(
                jnp.dot(lhs, w, preferred_element_type=jnp.float32) + b, 0.0)
            layer += 1

        # BatchNorm1d, training mode (batch mean, biased variance).
        # Two independent reductions, then a single scale/shift pass.
        gamma = v_ref[pl.ds(N_LAYERS + blk, 1), :]       # (1, PAD)
        beta = v_ref[pl.ds(N_LAYERS + 3 + blk, 1), :]    # (1, PAD)
        s1 = jnp.sum(x, axis=0, keepdims=True)           # (1, PAD)
        s2 = jnp.sum(x * x, axis=0, keepdims=True)       # (1, PAD)
        mean = s1 * inv_b
        var = s2 * inv_b - mean * mean
        scale = gamma * jax.lax.rsqrt(var + BN_EPS)      # 0 on pad lanes
        shift = beta - mean * scale                      # 0 on pad lanes
        x = x * scale + shift

    # Final projection (self_supervised=True branch).
    w = w_ref[layer]
    b = v_ref[pl.ds(layer, 1), :]
    out_ref[0] = jnp.dot(x[:, :SUB], w, preferred_element_type=jnp.float32) + b


# --------------------------------------------------------------------------
# Parameter construction & packing
# --------------------------------------------------------------------------
def init_params(key, in_channel):
    """Deterministic synthetic parameters, PyTorch-Linear-like uniform init."""
    weights, biases = [], []
    for (fin, fout) in _layer_dims(in_channel):
        key, k1, k2 = jax.random.split(key, 3)
        bound = 1.0 / jnp.sqrt(jnp.float32(fin))
        weights.append(
            jax.random.uniform(k1, (fin, fout), jnp.float32, -bound, bound))
        biases.append(
            jax.random.uniform(k2, (fout,), jnp.float32, -bound, bound))
    gammas = [jnp.ones((f,), jnp.float32) for f in BN_FEATS]
    betas = [jnp.zeros((f,), jnp.float32) for f in BN_FEATS]
    return weights, biases, gammas, betas


def pack_params(weights, biases, gammas, betas):
    """Pack all parameters into two lane-dense f32 slabs (2 DMAs total)."""
    w_slab = jnp.zeros((N_LAYERS, SUB, PAD), jnp.float32)
    for i, w in enumerate(weights):
        assert w.shape[0] <= SUB and w.shape[1] <= PAD
        w_slab = w_slab.at[i, : w.shape[0], : w.shape[1]].set(w)

    v_slab = jnp.zeros((N_VECS, PAD), jnp.float32)
    for i, b in enumerate(biases):
        v_slab = v_slab.at[i, : b.shape[0]].set(b)
    for i, g in enumerate(gammas):
        v_slab = v_slab.at[N_LAYERS + i, : g.shape[0]].set(g)
    for i, bt in enumerate(betas):
        v_slab = v_slab.at[N_LAYERS + 3 + i, : bt.shape[0]].set(bt)
    return w_slab, v_slab


# --------------------------------------------------------------------------
# Wrappers
# --------------------------------------------------------------------------
@jax.jit
def blocks_forward_batched(xs, w_slab, v_slab):
    """xs: (N, B, c_in) -- N independent batches (BN stats computed per batch)."""
    N, B, c_in = xs.shape
    cin8 = -(-c_in // 8) * 8                       # round up to sublane multiple
    assert cin8 <= SUB, "in_channel must be <= 32 for this weight packing"
    xs = xs.astype(jnp.float32)
    if cin8 != c_in:                               # tiny lane pad, rarely taken
        xs = jnp.pad(xs, ((0, 0), (0, 0), (0, cin8 - c_in)))

    dims = _layer_dims(c_in)
    real_flops = 2 * N * B * sum(fi * fo for fi, fo in dims)
    bytes_accessed = 4 * (xs.size + w_slab.size + v_slab.size + N * B * OUT_DIM)

    kernel = functools.partial(_blocks_kernel, cin8=cin8)

    out_pad = pl.pallas_call(
        kernel,
        out_shape=jax.ShapeDtypeStruct((N, B, PAD), jnp.float32),
        grid=(N,),
        in_specs=[
            pl.BlockSpec((1, B, cin8), lambda i: (i, 0, 0)),
            # Grid-invariant parameter blocks: DMA'd once, VMEM-resident.
            pl.BlockSpec((N_LAYERS, SUB, PAD), lambda i: (0, 0, 0)),
            pl.BlockSpec((N_VECS, PAD), lambda i: (0, 0)),
        ],
        out_specs=pl.BlockSpec((1, B, PAD), lambda i: (i, 0, 0)),
        compiler_params=pltpu.CompilerParams(
            dimension_semantics=("parallel",),      # shards across v7x's 2 TCs
            vmem_limit_bytes=8 * 1024 * 1024),
        cost_estimate=pl.CostEstimate(
            flops=real_flops, transcendentals=3 * N * PAD,
            bytes_accessed=bytes_accessed),
    )(xs, w_slab, v_slab)

    return out_pad[..., :OUT_DIM]


@jax.jit
def blocks_forward(x, w_slab, v_slab):
    """Original 2-D module signature: x is (B, c_in), one BN batch."""
    return blocks_forward_batched(x[None], w_slab, v_slab)[0]


# --------------------------------------------------------------------------
# Pure-JAX reference (unpadded) for correctness checking
# --------------------------------------------------------------------------
def blocks_reference(x, weights, biases, gammas, betas):
    x = x.astype(jnp.float32)
    li = 0
    for blk in range(3):
        for _ in range(3):
            x = jnp.maximum(x @ weights[li] + biases[li], 0.0)
            li += 1
        mean = jnp.mean(x, axis=0, keepdims=True)
        var = jnp.mean((x - mean) ** 2, axis=0, keepdims=True)
        x = (x - mean) / jnp.sqrt(var + BN_EPS) * gammas[blk] + betas[blk]
    return x @ weights[li] + biases[li]


if __name__ == "__main__":
    key = jax.random.PRNGKey(0)
    kx, kp = jax.random.split(key)

    n_batches, batch, in_channel = 4, 8, 16
    xs = jax.random.normal(kx, (n_batches, batch, in_channel), jnp.float32)

    weights, biases, gammas, betas = init_params(kp, in_channel)
    w_slab, v_slab = pack_params(weights, biases, gammas, betas)

    # Batched path: grid over 4 independent batches, weights VMEM-resident.
    out = jax.block_until_ready(blocks_forward_batched(xs, w_slab, v_slab))
    assert out.shape == (n_batches, batch, OUT_DIM), out.shape

    ref = jnp.stack([
        blocks_reference(xs[i], weights, biases, gammas, betas)
        for i in range(n_batches)])
    max_err = float(jnp.max(jnp.abs(out - ref)))
    assert jnp.allclose(out, ref, atol=5e-4, rtol=5e-4), max_err

    # Original module signature (single batch).
    out1 = jax.block_until_ready(blocks_forward(xs[0], w_slab, v_slab))
    assert out1.shape == (batch, OUT_DIM), out1.shape
    assert jnp.allclose(out1, ref[0], atol=5e-4, rtol=5e-4)

    print("KERNEL_OK")
</pallas_src>

<mosaic_0001>
module attributes {stable_mosaic.version = 11 : i64} {
  func.func @_blocks_kernel(%arg0: i32, %arg1: memref<1x8x16xf32, #tpu.memory_space<vmem>>, %arg2: memref<10x32x128xf32, #tpu.memory_space<vmem>>, %arg3: memref<16x128xf32, #tpu.memory_space<vmem>>, %arg4: memref<1x8x128xf32, #tpu.memory_space<vmem>>) attributes {dimension_semantics = [#tpu.dimension_semantics<parallel>], iteration_bounds = array<i64: 4>, scalar_prefetch = 0 : i64, scratch_operands = 0 : i64, tpu.core_type = #tpu.core_type<tc>, window_params = [{transform_indices = @transform_0, window_bounds = array<i64: 1, 8, 16>}, {pipeline_mode = #tpu.pipeline_mode<synchronous>, transform_indices = @transform_1, window_bounds = array<i64: 10, 32, 128>}, {pipeline_mode = #tpu.pipeline_mode<synchronous>, transform_indices = @transform_2, window_bounds = array<i64: 16, 128>}, {transform_indices = @transform_3, window_bounds = array<i64: 1, 8, 128>}]} {
    %c0 = arith.constant 0 : index
    %c0_0 = arith.constant 0 : index
    %c0_1 = arith.constant 0 : index
    %0 = vector.load %arg1[%c0, %c0_0, %c0_1] : memref<1x8x16xf32, #tpu.memory_space<vmem>>, vector<1x8x16xf32>
    %1 = vector.shape_cast %0 : vector<1x8x16xf32> to vector<8x16xf32>
    %c0_2 = arith.constant 0 : index
    %c0_3 = arith.constant 0 : index
    %c0_4 = arith.constant 0 : index
    %2 = vector.load %arg2[%c0_2, %c0_3, %c0_4] : memref<10x32x128xf32, #tpu.memory_space<vmem>>, vector<1x16x128xf32>
    %3 = vector.shape_cast %2 : vector<1x16x128xf32> to vector<16x128xf32>
    %c0_5 = arith.constant 0 : index
    %c0_6 = arith.constant 0 : index
    %4 = vector.load %arg3[%c0_5, %c0_6] : memref<16x128xf32, #tpu.memory_space<vmem>>, vector<1x128xf32>
    %cst = arith.constant dense<0.000000e+00> : vector<8x128xf32>
    %5 = tpu.matmul %1, %3, %cst {dimension_numbers = #tpu.dot_dimension_numbers<[1], [0], [0], [1], [0, 0, 1, 1], [], []>} : vector<8x16xf32>, vector<16x128xf32>, vector<8x128xf32> -> vector<8x128xf32>
    %6 = vector.broadcast %4 : vector<1x128xf32> to vector<8x128xf32>
    %7 = arith.addf %5, %6 : vector<8x128xf32>
    %cst_7 = arith.constant 0.000000e+00 : f32
    %8 = vector.broadcast %cst_7 : f32 to vector<8x128xf32>
    %9 = arith.maximumf %7, %8 : vector<8x128xf32>
    %c1 = arith.constant 1 : index
    %c0_8 = arith.constant 0 : index
    %c0_9 = arith.constant 0 : index
    %10 = vector.load %arg2[%c1, %c0_8, %c0_9] : memref<10x32x128xf32, #tpu.memory_space<vmem>>, vector<1x32x128xf32>
    %11 = vector.shape_cast %10 : vector<1x32x128xf32> to vector<32x128xf32>
    %12 = vector.extract_strided_slice %9 {offsets = [0, 0], sizes = [8, 32], strides = [1, 1]} : vector<8x128xf32> to vector<8x32xf32>
    %c1_10 = arith.constant 1 : index
    %c0_11 = arith.constant 0 : index
    %13 = vector.load %arg3[%c1_10, %c0_11] : memref<16x128xf32, #tpu.memory_space<vmem>>, vector<1x128xf32>
    %cst_12 = arith.constant dense<0.000000e+00> : vector<8x128xf32>
    %14 = tpu.matmul %12, %11, %cst_12 {dimension_numbers = #tpu.dot_dimension_numbers<[1], [0], [0], [1], [0, 0, 1, 1], [], []>} : vector<8x32xf32>, vector<32x128xf32>, vector<8x128xf32> -> vector<8x128xf32>
    %15 = vector.broadcast %13 : vector<1x128xf32> to vector<8x128xf32>
    %16 = arith.addf %14, %15 : vector<8x128xf32>
    %cst_13 = arith.constant 0.000000e+00 : f32
    %17 = vector.broadcast %cst_13 : f32 to vector<8x128xf32>
    %18 = arith.maximumf %16, %17 : vector<8x128xf32>
    %c2 = arith.constant 2 : index
    %c0_14 = arith.constant 0 : index
    %c0_15 = arith.constant 0 : index
    %19 = vector.load %arg2[%c2, %c0_14, %c0_15] : memref<10x32x128xf32, #tpu.memory_space<vmem>>, vector<1x32x128xf32>
    %20 = vector.shape_cast %19 : vector<1x32x128xf32> to vector<32x128xf32>
    %21 = vector.extract_strided_slice %18 {offsets = [0, 0], sizes = [8, 32], strides = [1, 1]} : vector<8x128xf32> to vector<8x32xf32>
    %c2_16 = arith.constant 2 : index
    %c0_17 = arith.constant 0 : index
    %22 = vector.load %arg3[%c2_16, %c0_17] : memref<16x128xf32, #tpu.memory_space<vmem>>, vector<1x128xf32>
    %cst_18 = arith.constant dense<0.000000e+00> : vector<8x128xf32>
    %23 = tpu.matmul %21, %20, %cst_18 {dimension_numbers = #tpu.dot_dimension_numbers<[1], [0], [0], [1], [0, 0, 1, 1], [], []>} : vector<8x32xf32>, vector<32x128xf32>, vector<8x128xf32> -> vector<8x128xf32>
    %24 = vector.broadcast %22 : vector<1x128xf32> to vector<8x128xf32>
    %25 = arith.addf %23, %24 : vector<8x128xf32>
    %cst_19 = arith.constant 0.000000e+00 : f32
    %26 = vector.broadcast %cst_19 : f32 to vector<8x128xf32>
    %27 = arith.maximumf %25, %26 : vector<8x128xf32>
    %c10 = arith.constant 10 : index
    %c0_20 = arith.constant 0 : index
    %28 = vector.load %arg3[%c10, %c0_20] : memref<16x128xf32, #tpu.memory_space<vmem>>, vector<1x128xf32>
    %c13 = arith.constant 13 : index
    %c0_21 = arith.constant 0 : index
    %29 = vector.load %arg3[%c13, %c0_21] : memref<16x128xf32, #tpu.memory_space<vmem>>, vector<1x128xf32>
    %cst_22 = arith.constant dense<0.000000e+00> : vector<128xf32>
    %30 = vector.multi_reduction <add>, %27, %cst_22 [0] : vector<8x128xf32> to vector<128xf32>
    %31 = vector.shape_cast %30 : vector<128xf32> to vector<1x128xf32>
    %32 = arith.mulf %27, %27 : vector<8x128xf32>
    %cst_23 = arith.constant dense<0.000000e+00> : vector<128xf32>
    %33 = vector.multi_reduction <add>, %32, %cst_23 [0] : vector<8x128xf32> to vector<128xf32>
    %34 = vector.shape_cast %33 : vector<128xf32> to vector<1x128xf32>
    %cst_24 = arith.constant 1.250000e-01 : f32
    %35 = vector.broadcast %cst_24 : f32 to vector<1x128xf32>
    %36 = arith.mulf %31, %35 : vector<1x128xf32>
    %cst_25 = arith.constant 1.250000e-01 : f32
    %37 = vector.broadcast %cst_25 : f32 to vector<1x128xf32>
    %38 = arith.mulf %34, %37 : vector<1x128xf32>
    %39 = arith.mulf %36, %36 : vector<1x128xf32>
    %40 = arith.subf %38, %39 : vector<1x128xf32>
    %cst_26 = arith.constant 9.99999974E-6 : f32
    %41 = vector.broadcast %cst_26 : f32 to vector<1x128xf32>
    %42 = arith.addf %40, %41 : vector<1x128xf32>
    %43 = math.rsqrt %42 : vector<1x128xf32>
    %44 = arith.mulf %28, %43 : vector<1x128xf32>
    %45 = arith.mulf %36, %44 : vector<1x128xf32>
    %46 = arith.subf %29, %45 : vector<1x128xf32>
    %47 = vector.broadcast %44 : vector<1x128xf32> to vector<8x128xf32>
    %48 = arith.mulf %27, %47 : vector<8x128xf32>
    %49 = vector.broadcast %46 : vector<1x128xf32> to vector<8x128xf32>
    %50 = arith.addf %48, %49 : vector<8x128xf32>
    %c3 = arith.constant 3 : index
    %c0_27 = arith.constant 0 : index
    %c0_28 = arith.constant 0 : index
    %51 = vector.load %arg2[%c3, %c0_27, %c0_28] : memref<10x32x128xf32, #tpu.memory_space<vmem>>, vector<1x32x128xf32>
    %52 = vector.shape_cast %51 : vector<1x32x128xf32> to vector<32x128xf32>
    %53 = vector.extract_strided_slice %50 {offsets = [0, 0], sizes = [8, 32], strides = [1, 1]} : vector<8x128xf32> to vector<8x32xf32>
    %c3_29 = arith.constant 3 : index
    %c0_30 = arith.constant 0 : index
    %54 = vector.load %arg3[%c3_29, %c0_30] : memref<16x128xf32, #tpu.memory_space<vmem>>, vector<1x128xf32>
    %cst_31 = arith.constant dense<0.000000e+00> : vector<8x128xf32>
    %55 = tpu.matmul %53, %52, %cst_31 {dimension_numbers = #tpu.dot_dimension_numbers<[1], [0], [0], [1], [0, 0, 1, 1], [], []>} : vector<8x32xf32>, vector<32x128xf32>, vector<8x128xf32> -> vector<8x128xf32>
    %56 = vector.broadcast %54 : vector<1x128xf32> to vector<8x128xf32>
    %57 = arith.addf %55, %56 : vector<8x128xf32>
    %cst_32 = arith.constant 0.000000e+00 : f32
    %58 = vector.broadcast %cst_32 : f32 to vector<8x128xf32>
    %59 = arith.maximumf %57, %58 : vector<8x128xf32>
    %c4 = arith.constant 4 : index
    %c0_33 = arith.constant 0 : index
    %c0_34 = arith.constant 0 : index
    %60 = vector.load %arg2[%c4, %c0_33, %c0_34] : memref<10x32x128xf32, #tpu.memory_space<vmem>>, vector<1x32x128xf32>
    %61 = vector.shape_cast %60 : vector<1x32x128xf32> to vector<32x128xf32>
    %62 = vector.extract_strided_slice %59 {offsets = [0, 0], sizes = [8, 32], strides = [1, 1]} : vector<8x128xf32> to vector<8x32xf32>
    %c4_35 = arith.constant 4 : index
    %c0_36 = arith.constant 0 : index
    %63 = vector.load %arg3[%c4_35, %c0_36] : memref<16x128xf32, #tpu.memory_space<vmem>>, vector<1x128xf32>
    %cst_37 = arith.constant dense<0.000000e+00> : vector<8x128xf32>
    %64 = tpu.matmul %62, %61, %cst_37 {dimension_numbers = #tpu.dot_dimension_numbers<[1], [0], [0], [1], [0, 0, 1, 1], [], []>} : vector<8x32xf32>, vector<32x128xf32>, vector<8x128xf32> -> vector<8x128xf32>
    %65 = vector.broadcast %63 : vector<1x128xf32> to vector<8x128xf32>
    %66 = arith.addf %64, %65 : vector<8x128xf32>
    %cst_38 = arith.constant 0.000000e+00 : f32
    %67 = vector.broadcast %cst_38 : f32 to vector<8x128xf32>
    %68 = arith.maximumf %66, %67 : vector<8x128xf32>
    %c5 = arith.constant 5 : index
    %c0_39 = arith.constant 0 : index
    %c0_40 = arith.constant 0 : index
    %69 = vector.load %arg2[%c5, %c0_39, %c0_40] : memref<10x32x128xf32, #tpu.memory_space<vmem>>, vector<1x32x128xf32>
    %70 = vector.shape_cast %69 : vector<1x32x128xf32> to vector<32x128xf32>
    %71 = vector.extract_strided_slice %68 {offsets = [0, 0], sizes = [8, 32], strides = [1, 1]} : vector<8x128xf32> to vector<8x32xf32>
    %c5_41 = arith.constant 5 : index
    %c0_42 = arith.constant 0 : index
    %72 = vector.load %arg3[%c5_41, %c0_42] : memref<16x128xf32, #tpu.memory_space<vmem>>, vector<1x128xf32>
    %cst_43 = arith.constant dense<0.000000e+00> : vector<8x128xf32>
    %73 = tpu.matmul %71, %70, %cst_43 {dimension_numbers = #tpu.dot_dimension_numbers<[1], [0], [0], [1], [0, 0, 1, 1], [], []>} : vector<8x32xf32>, vector<32x128xf32>, vector<8x128xf32> -> vector<8x128xf32>
    %74 = vector.broadcast %72 : vector<1x128xf32> to vector<8x128xf32>
    %75 = arith.addf %73, %74 : vector<8x128xf32>
    %cst_44 = arith.constant 0.000000e+00 : f32
    %76 = vector.broadcast %cst_44 : f32 to vector<8x128xf32>
    %77 = arith.maximumf %75, %76 : vector<8x128xf32>
    %c11 = arith.constant 11 : index
    %c0_45 = arith.constant 0 : index
    %78 = vector.load %arg3[%c11, %c0_45] : memref<16x128xf32, #tpu.memory_space<vmem>>, vector<1x128xf32>
    %c14 = arith.constant 14 : index
    %c0_46 = arith.constant 0 : index
    %79 = vector.load %arg3[%c14, %c0_46] : memref<16x128xf32, #tpu.memory_space<vmem>>, vector<1x128xf32>
    %cst_47 = arith.constant dense<0.000000e+00> : vector<128xf32>
    %80 = vector.multi_reduction <add>, %77, %cst_47 [0] : vector<8x128xf32> to vector<128xf32>
    %81 = vector.shape_cast %80 : vector<128xf32> to vector<1x128xf32>
    %82 = arith.mulf %77, %77 : vector<8x128xf32>
    %cst_48 = arith.constant dense<0.000000e+00> : vector<128xf32>
    %83 = vector.multi_reduction <add>, %82, %cst_48 [0] : vector<8x128xf32> to vector<128xf32>
    %84 = vector.shape_cast %83 : vector<128xf32> to vector<1x128xf32>
    %cst_49 = arith.constant 1.250000e-01 : f32
    %85 = vector.broadcast %cst_49 : f32 to vector<1x128xf32>
    %86 = arith.mulf %81, %85 : vector<1x128xf32>
    %cst_50 = arith.constant 1.250000e-01 : f32
    %87 = vector.broadcast %cst_50 : f32 to vector<1x128xf32>
    %88 = arith.mulf %84, %87 : vector<1x128xf32>
    %89 = arith.mulf %86, %86 : vector<1x128xf32>
    %90 = arith.subf %88, %89 : vector<1x128xf32>
    %cst_51 = arith.constant 9.99999974E-6 : f32
    %91 = vector.broadcast %cst_51 : f32 to vector<1x128xf32>
    %92 = arith.addf %90, %91 : vector<1x128xf32>
    %93 = math.rsqrt %92 : vector<1x128xf32>
    %94 = arith.mulf %78, %93 : vector<1x128xf32>
    %95 = arith.mulf %86, %94 : vector<1x128xf32>
    %96 = arith.subf %79, %95 : vector<1x128xf32>
    %97 = vector.broadcast %94 : vector<1x128xf32> to vector<8x128xf32>
    %98 = arith.mulf %77, %97 : vector<8x128xf32>
    %99 = vector.broadcast %96 : vector<1x128xf32> to vector<8x128xf32>
    %100 = arith.addf %98, %99 : vector<8x128xf32>
    %c6 = arith.constant 6 : index
    %c0_52 = arith.constant 0 : index
    %c0_53 = arith.constant 0 : index
    %101 = vector.load %arg2[%c6, %c0_52, %c0_53] : memref<10x32x128xf32, #tpu.memory_space<vmem>>, vector<1x32x128xf32>
    %102 = vector.shape_cast %101 : vector<1x32x128xf32> to vector<32x128xf32>
    %103 = vector.extract_strided_slice %100 {offsets = [0, 0], sizes = [8, 32], strides = [1, 1]} : vector<8x128xf32> to vector<8x32xf32>
    %c6_54 = arith.constant 6 : index
    %c0_55 = arith.constant 0 : index
    %104 = vector.load %arg3[%c6_54, %c0_55] : memref<16x128xf32, #tpu.memory_space<vmem>>, vector<1x128xf32>
    %cst_56 = arith.constant dense<0.000000e+00> : vector<8x128xf32>
    %105 = tpu.matmul %103, %102, %cst_56 {dimension_numbers = #tpu.dot_dimension_numbers<[1], [0], [0], [1], [0, 0, 1, 1], [], []>} : vector<8x32xf32>, vector<32x128xf32>, vector<8x128xf32> -> vector<8x128xf32>
    %106 = vector.broadcast %104 : vector<1x128xf32> to vector<8x128xf32>
    %107 = arith.addf %105, %106 : vector<8x128xf32>
    %cst_57 = arith.constant 0.000000e+00 : f32
    %108 = vector.broadcast %cst_57 : f32 to vector<8x128xf32>
    %109 = arith.maximumf %107, %108 : vector<8x128xf32>
    %c7 = arith.constant 7 : index
    %c0_58 = arith.constant 0 : index
    %c0_59 = arith.constant 0 : index
    %110 = vector.load %arg2[%c7, %c0_58, %c0_59] : memref<10x32x128xf32, #tpu.memory_space<vmem>>, vector<1x32x128xf32>
    %111 = vector.shape_cast %110 : vector<1x32x128xf32> to vector<32x128xf32>
    %112 = vector.extract_strided_slice %109 {offsets = [0, 0], sizes = [8, 32], strides = [1, 1]} : vector<8x128xf32> to vector<8x32xf32>
    %c7_60 = arith.constant 7 : index
    %c0_61 = arith.constant 0 : index
    %113 = vector.load %arg3[%c7_60, %c0_61] : memref<16x128xf32, #tpu.memory_space<vmem>>, vector<1x128xf32>
    %cst_62 = arith.constant dense<0.000000e+00> : vector<8x128xf32>
    %114 = tpu.matmul %112, %111, %cst_62 {dimension_numbers = #tpu.dot_dimension_numbers<[1], [0], [0], [1], [0, 0, 1, 1], [], []>} : vector<8x32xf32>, vector<32x128xf32>, vector<8x128xf32> -> vector<8x128xf32>
    %115 = vector.broadcast %113 : vector<1x128xf32> to vector<8x128xf32>
    %116 = arith.addf %114, %115 : vector<8x128xf32>
    %cst_63 = arith.constant 0.000000e+00 : f32
    %117 = vector.broadcast %cst_63 : f32 to vector<8x128xf32>
    %118 = arith.maximumf %116, %117 : vector<8x128xf32>
    %c8 = arith.constant 8 : index
    %c0_64 = arith.constant 0 : index
    %c0_65 = arith.constant 0 : index
    %119 = vector.load %arg2[%c8, %c0_64, %c0_65] : memref<10x32x128xf32, #tpu.memory_space<vmem>>, vector<1x32x128xf32>
    %120 = vector.shape_cast %119 : vector<1x32x128xf32> to vector<32x128xf32>
    %121 = vector.extract_strided_slice %118 {offsets = [0, 0], sizes = [8, 32], strides = [1, 1]} : vector<8x128xf32> to vector<8x32xf32>
    %c8_66 = arith.constant 8 : index
    %c0_67 = arith.constant 0 : index
    %122 = vector.load %arg3[%c8_66, %c0_67] : memref<16x128xf32, #tpu.memory_space<vmem>>, vector<1x128xf32>
    %cst_68 = arith.constant dense<0.000000e+00> : vector<8x128xf32>
    %123 = tpu.matmul %121, %120, %cst_68 {dimension_numbers = #tpu.dot_dimension_numbers<[1], [0], [0], [1], [0, 0, 1, 1], [], []>} : vector<8x32xf32>, vector<32x128xf32>, vector<8x128xf32> -> vector<8x128xf32>
    %124 = vector.broadcast %122 : vector<1x128xf32> to vector<8x128xf32>
    %125 = arith.addf %123, %124 : vector<8x128xf32>
    %cst_69 = arith.constant 0.000000e+00 : f32
    %126 = vector.broadcast %cst_69 : f32 to vector<8x128xf32>
    %127 = arith.maximumf %125, %126 : vector<8x128xf32>
    %c12 = arith.constant 12 : index
    %c0_70 = arith.constant 0 : index
    %128 = vector.load %arg3[%c12, %c0_70] : memref<16x128xf32, #tpu.memory_space<vmem>>, vector<1x128xf32>
    %c15 = arith.constant 15 : index
    %c0_71 = arith.constant 0 : index
    %129 = vector.load %arg3[%c15, %c0_71] : memref<16x128xf32, #tpu.memory_space<vmem>>, vector<1x128xf32>
    %cst_72 = arith.constant dense<0.000000e+00> : vector<128xf32>
    %130 = vector.multi_reduction <add>, %127, %cst_72 [0] : vector<8x128xf32> to vector<128xf32>
    %131 = vector.shape_cast %130 : vector<128xf32> to vector<1x128xf32>
    %132 = arith.mulf %127, %127 : vector<8x128xf32>
    %cst_73 = arith.constant dense<0.000000e+00> : vector<128xf32>
    %133 = vector.multi_reduction <add>, %132, %cst_73 [0] : vector<8x128xf32> to vector<128xf32>
    %134 = vector.shape_cast %133 : vector<128xf32> to vector<1x128xf32>
    %cst_74 = arith.constant 1.250000e-01 : f32
    %135 = vector.broadcast %cst_74 : f32 to vector<1x128xf32>
    %136 = arith.mulf %131, %135 : vector<1x128xf32>
    %cst_75 = arith.constant 1.250000e-01 : f32
    %137 = vector.broadcast %cst_75 : f32 to vector<1x128xf32>
    %138 = arith.mulf %134, %137 : vector<1x128xf32>
    %139 = arith.mulf %136, %136 : vector<1x128xf32>
    %140 = arith.subf %138, %139 : vector<1x128xf32>
    %cst_76 = arith.constant 9.99999974E-6 : f32
    %141 = vector.broadcast %cst_76 : f32 to vector<1x128xf32>
    %142 = arith.addf %140, %141 : vector<1x128xf32>
    %143 = math.rsqrt %142 : vector<1x128xf32>
    %144 = arith.mulf %128, %143 : vector<1x128xf32>
    %145 = arith.mulf %136, %144 : vector<1x128xf32>
    %146 = arith.subf %129, %145 : vector<1x128xf32>
    %147 = vector.broadcast %144 : vector<1x128xf32> to vector<8x128xf32>
    %148 = arith.mulf %127, %147 : vector<8x128xf32>
    %149 = vector.broadcast %146 : vector<1x128xf32> to vector<8x128xf32>
    %150 = arith.addf %148, %149 : vector<8x128xf32>
    %c9 = arith.constant 9 : index
    %c0_77 = arith.constant 0 : index
    %c0_78 = arith.constant 0 : index
    %151 = vector.load %arg2[%c9, %c0_77, %c0_78] : memref<10x32x128xf32, #tpu.memory_space<vmem>>, vector<1x32x128xf32>
    %152 = vector.shape_cast %151 : vector<1x32x128xf32> to vector<32x128xf32>
    %c9_79 = arith.constant 9 : index
    %c0_80 = arith.constant 0 : index
    %153 = vector.load %arg3[%c9_79, %c0_80] : memref<16x128xf32, #tpu.memory_space<vmem>>, vector<1x128xf32>
    %154 = vector.extract_strided_slice %150 {offsets = [0, 0], sizes = [8, 32], strides = [1, 1]} : vector<8x128xf32> to vector<8x32xf32>
    %cst_81 = arith.constant dense<0.000000e+00> : vector<8x128xf32>
    %155 = tpu.matmul %154, %152, %cst_81 {dimension_numbers = #tpu.dot_dimension_numbers<[1], [0], [0], [1], [0, 0, 1, 1], [], []>} : vector<8x32xf32>, vector<32x128xf32>, vector<8x128xf32> -> vector<8x128xf32>
    %156 = vector.broadcast %153 : vector<1x128xf32> to vector<8x128xf32>
    %157 = arith.addf %155, %156 : vector<8x128xf32>
    %c0_82 = arith.constant 0 : index
    %c0_83 = arith.constant 0 : index
    %c0_84 = arith.constant 0 : index
    %158 = vector.load %arg4[%c0_82, %c0_83, %c0_84] : memref<1x8x128xf32, #tpu.memory_space<vmem>>, vector<1x8x128xf32>
    %159 = vector.shape_cast %158 : vector<1x8x128xf32> to vector<8x128xf32>
    %160 = vector.shape_cast %157 : vector<8x128xf32> to vector<1x8x128xf32>
    tpu.vector_store %arg4[%c0_82, %c0_83, %c0_84], %160 {strides = array<i32>} : memref<1x8x128xf32, #tpu.memory_space<vmem>>, vector<1x8x128xf32>,
    return
  }
  func.func @transform_0(%arg0: i32) -> (i32, i32, i32) {
    %c0_i32 = arith.constant 0 : i32
    %c0_i32_0 = arith.constant 0 : i32
    %c0_i32_1 = arith.constant 0 : i32
    return %arg0, %c0_i32, %c0_i32_0 : i32, i32, i32
  }
  func.func @transform_1(%arg0: i32) -> (i32, i32, i32) {
    %c0_i32 = arith.constant 0 : i32
    %c0_i32_0 = arith.constant 0 : i32
    %c0_i32_1 = arith.constant 0 : i32
    %c0_i32_2 = arith.constant 0 : i32
    return %c0_i32, %c0_i32_0, %c0_i32_1 : i32, i32, i32
  }
  func.func @transform_2(%arg0: i32) -> (i32, i32) {
    %c0_i32 = arith.constant 0 : i32
    %c0_i32_0 = arith.constant 0 : i32
    %c0_i32_1 = arith.constant 0 : i32
    return %c0_i32, %c0_i32_0 : i32, i32
  }
  func.func @transform_3(%arg0: i32) -> (i32, i32, i32) {
    %c0_i32 = arith.constant 0 : i32
    %c0_i32_0 = arith.constant 0 : i32
    %c0_i32_1 = arith.constant 0 : i32
    return %arg0, %c0_i32, %c0_i32_0 : i32, i32, i32
  }
}

</mosaic_0001>

<bundles_post_ra>
// kernel: blocks_forward_batched.1
= control target key start
LH: loop header
LB: loop body
LE: loop exit
PB: predicated region body
PF: predicated region fallthrough
CT: control target
= control target key end

     0   :  { %8 = vsyncpa [#allocation3], 0  ;;  %s1939_s0 = inlined_call_operand.hbm [shape: f32[4,8,16], index: 0, kind: input, shape index: {}]   ;;  %s1940_s1 = inlined_call_operand.hbm [shape: f32[10,32,128], index: 1, kind: input, shape index: {}]   ;;  %s1941_s2 = inlined_call_operand.hbm [shape: f32[16,128], index: 2, kind: input, shape index: {}]   ;;  %s1942_s3 = inlined_call_operand.vmem [shape: f32[4,8,128], index: 3, kind: output, shape index: {}]  }
   0x1   :  { %10 = vsyncpa [#allocation3 + $0x1], 0 }
   0x2   :  { %11 = vsyncpa [#allocation5], 0  ;;  %s1711_s12 = smov 0   ;;  %s1713_s13 = smov 0  }
   0x3   :  { %s1715_s14 = smov 0   ;;  %s1717_s15 = smov 0  }
   0x4 LB: > { %s1730_s16 = sadd.s32 4294967295, %s1681_s15   ;;  %p37_p0 = scmp.ne.s32.totalorder %s1673_s13, %s1669_s12  ;;  %s1681_s15 = sphi %s1717_s15, %s1957_s15   ;;  %s1677_s14 = sphi %s1715_s14, %s1956_s14   ;;  %s1673_s13 = sphi %s1713_s13, %s1955_s13   ;;  %s1669_s12 = sphi %s1711_s12, %s1954_s12  }
   0x5   : > { %p1943_p1 = scmp.eq.s32.totalorder %s1730_s16, 0  ;;  %p1242_p2 = scmp.ge.s32.totalorder %s1681_s15, 1 }
   0x6   : > { %p116_p3 = scmp.lt.s32.totalorder %s1681_s15, 5  ;;  %s1683_s19 = smov [#allocation4]  }
   0x7   : > { %p1738_p4 = por %p1943_p1, %p37_p0  ;;  %s128_s20 = sshll.u32 %s1683_s19, 4  ;;  %s129_s20 = int_to_ptr.vmem [resolvable:$true] %s128_s20 }
   0x8   : > { %p1742_p5 = pnand %p1242_p2, %p116_p3  ;;  %s1684_s22 = smov [#allocation6]  }
   0x9   : > { %s1946_s17 = scalar_select %p1738_p4, 1, 0 }
   0xa   : > { %s1947_s18 = scalar_select %p1742_p5, 1, 0 }
   0xb   : > { %p1496_p6 = pneg %p1742_p5  ;;  %s141_s23 = sshll.u32 %s1684_s22, 4  ;;  %s1754_s23 = int_to_ptr.vmem [resolvable:$true] %s141_s23 }
   0xc   : > { %s1557_s26 = scalar_lea.hbm %s1940_s1, 5120 }
   0xd   : > { %p1750_p7 = pnand %p1496_p6, %p1943_p1  ;;  %p1558_p8 = scmp.ne.s32.totalorder %s1940_s1, %s1557_s26 }
   0xe   : > { %p1564_p12 = scmp.lt.u32.totalorder %s1557_s26, %s1940_s1 }
   0xf   : > { %p1559_p9 = pneg %p1750_p7 }
  0x11   : > { %p1560_p10 = pnand %p1559_p9, %p1558_p8 }
  0x13   : > { %p1561_p11 = pneg %p1560_p10 }
  0x15   : > { %p1566_p13 = pnand %p1564_p12, %p1561_p11 }
  0x17   : > { %1569 = shalt.err (!%p1566_p13)
}
  0x18   : > { %s1570_s4 = scalar_lea.vmem %s129_s20, 5120  ;;  %p1578_p6 = scmp.lt.s32.totalorder %s129_s20, %s129_s20 }
  0x19   : > { %p1571_p0 = scmp.ne.s32.totalorder %s129_s20, %s1570_s4  ;;  %p1579_p1 = scmp.lt.s32.totalorder %s1570_s4, %s1570_s4 }
  0x1b   : > { %p1573_p2 = pnand %p1571_p0, %p1559_p9  ;;  %p1580_p4 = por %p1579_p1, %p1578_p6 }
  0x1d   : > { %p1574_p3 = pneg %p1573_p2 }
  0x1f   : > { %p1581_p5 = pnand %p1580_p4, %p1574_p3 }
  0x21   : > { %1584 = shalt.err (!%p1581_p5)
}
  0x22   : > { %s1685_s5 = smov 128   ;;  %s1686_s6 = smov 8  }
  0x23   : > { %1499 = dma.hbm_to_vmem [thread:$0]  (!%p1750_p7), %s1940_s1, 5120, %s129_s20, [#allocation5], %s1685_s5, %s1685_s5, %s1686_s6  }
  0x24   : > { %s1585_s11 = scalar_lea.hbm %s1941_s2, 256 }
  0x25   : > { %p1586_p8 = scmp.ne.s32.totalorder %s1941_s2, %s1585_s11  ;;  %p1592_p5 = scmp.lt.u32.totalorder %s1585_s11, %s1941_s2 }
  0x27   : > { %p1588_p1 = pnand %p1586_p8, %p1559_p9 }
  0x29   : > { %p1589_p4 = pneg %p1588_p1 }
  0x2b   : > { %p1594_p10 = pnand %p1592_p5, %p1589_p4 }
  0x2d   : > { %1597 = shalt.err (!%p1594_p10)
}
  0x2e   : > { %s1598_s20 = scalar_lea.vmem %s1754_s23, 256  ;;  %p1606_p0 = scmp.lt.s32.totalorder %s1754_s23, %s1754_s23 }
  0x2f   : > { %p1599_p11 = scmp.ne.s32.totalorder %s1754_s23, %s1598_s20  ;;  %p1607_p2 = scmp.lt.s32.totalorder %s1598_s20, %s1598_s20 }
  0x31   : > { %p1601_p12 = pnand %p1599_p11, %p1559_p9  ;;  %p1608_p3 = por %p1607_p2, %p1606_p0 }
  0x33   : > { %p1602_p13 = pneg %p1601_p12 }
  0x35   : > { %p1609_p6 = pnand %p1608_p3, %p1602_p13 }
  0x37   : > { %1612 = shalt.err (!%p1609_p6)
}
  0x38   : > { %1502 = dma.hbm_to_vmem [thread:$0]  (!%p1750_p7), %s1941_s2, 256, %s1754_s23, [#allocation5], %s1685_s5, %s1685_s5, %s1686_s6  }
  0x39   : > { %s1804_s27 = sadd.s32 1, %s1681_s15   ;;  %s24_s28 = sadd.s32 1, %s1677_s14 }
  0x3a   : > { %s21_s21 = ssub.s32 %s1681_s15, %s1804_s27  ;;  %p31_p9 = scmp.ne.s32.totalorder %s1677_s14, %s1673_s13 }
  0x3b   : > { %p22_p8 = scmp.eq.s32.totalorder %s21_s21, 0  ;;  %p32_p1 = scmp.eq.s32.totalorder %s1681_s15, 0 }
  0x3c   : > { %p1509_p4 = scmp.lt.s32.totalorder %s1681_s15, 4  ;;  %s155_s29 = sand.u32 1, %s1677_s14  }
  0x3d   : > { %s1815_s30 = scalar_select %p22_p8, %s1677_s14, %s24_s28  }
  0x3e   : > { %p33_p5 = por %p32_p1, %p31_p9  ;;  %s1246_s4 = sshll.u32 %s155_s29, 3 }
  0x3f   : > { %s1247_s7 = sshll.u32 %s1681_s15, 7  ;;  %s159_s23 = scalar_lea.vmem [#allocation2], %s1246_s4 }
  0x40   : > { %s1821_s10 = scalar_lea.hbm %s1939_s0, %s1247_s7  ;;  %s166_s5 = sshll.u32 %s159_s23, 4  ;;  %s1827_s5 = int_to_ptr.vmem [resolvable:$true] %s166_s5 }
  0x41   : > { %p1823_p7 = pnand %p1509_p4, %p33_p5  ;;  %s156_s15 = scalar_lea.sflag [#allocation3], %s155_s29 }
  0x42   : > { %s1613_s11 = scalar_lea.hbm %s1821_s10, 128  ;;  %s1618_s22 = scalar_lea.hbm %s1939_s0, 512 }
  0x43   : > { %p1614_p10 = scmp.ne.s32.totalorder %s1821_s10, %s1613_s11  ;;  %p1615_p11 = pneg %p1823_p7 }
  0x44   : > { %p1619_p0 = scmp.lt.u32.totalorder %s1821_s10, %s1939_s0  ;;  %p1620_p2 = scmp.lt.u32.totalorder %s1618_s22, %s1613_s11 }
  0x45   : > { %p1616_p12 = pnand %p1615_p11, %p1614_p10  ;;  %p1622_p6 = scmp.lt.u32.totalorder %s1613_s11, %s1821_s10 }
  0x46   : > { %p1621_p3 = por %p1620_p2, %p1619_p0 }
  0x47   : > { %p1617_p13 = pneg %p1616_p12 }
  0x48   : > { %p1623_p9 = por %p1622_p6, %p1621_p3 }
  0x4a   : > { %p1624_p8 = pnand %p1623_p9, %p1617_p13 }
  0x4c   : > { %1627 = shalt.err (!%p1624_p8)
}
  0x4d   : > { %s1628_s25 = scalar_lea.vmem %s1827_s5, 128  ;;  %s1687_s26 = smov [#allocation2]  }
  0x4e   : > { %p1629_p1 = scmp.ne.s32.totalorder %s1827_s5, %s1628_s25  ;;  %s1633_s28 = sshll.u32 %s1687_s26, 4  ;;  %s1634_s28 = int_to_ptr.vmem [resolvable:$false] %s1633_s28 }
  0x4f   : > { %s1635_s21 = scalar_lea.vmem %s1634_s28, 256  ;;  %p1636_p10 = scmp.lt.s32.totalorder %s1827_s5, %s1634_s28 }
  0x50   : > { %p1631_p4 = pnand %p1629_p1, %p1615_p11  ;;  %p1637_p12 = scmp.lt.s32.totalorder %s1635_s21, %s1628_s25 }
  0x52   : > { %p1632_p5 = pneg %p1631_p4  ;;  %p1638_p0 = por %p1637_p12, %p1636_p10 }
  0x54   : > { %p1639_p2 = pnand %p1638_p0, %p1632_p5 }
  0x56   : > { %1642 = shalt.err (!%p1639_p2)
}
  0x57   : > { %1506 = dma.hbm_to_vmem [thread:$0]  (!%p1823_p7), %s1821_s10, 128, %s1827_s5, %s156_s15  }
  0x58   : > { %p1950_p13 = scmp.ne.s32.totalorder %s1947_s18, 0 }
  0x59   : > { %s177_s29 = sand.u32 (!%p1950_p13), 1, %s1673_s13   ;;  %p1951_p11 = scmp.ne.s32.totalorder (!%p1950_p13), %s1946_s17, 0 }
  0x5a   : > { %175 = sbr.rel (%p1950_p13) target bundleno = 2389 (0x955), region = 32  ;;  %s1249_s4 = sshll.u32 (!%p1950_p13), %s177_s29, 3 }
  0x5b   : > { %s178_s7 = scalar_lea.sflag (!%p1950_p13), [#allocation3], %s177_s29  ;;  %s181_s8 = scalar_lea.vmem (!%p1950_p13), [#allocation2], %s1249_s4 }
  0x61   : > { %1660 = dma.done.wait (%p1951_p11), %s178_s7, 128  }
  0x62   : > { %1662 = vsyncadd (%p1951_p11), %s178_s7, 4294967168  ;;  %p1952_p3 = scmp.eq.s32.totalorder %s1730_s16, 0 }
  0x64   : > { %1664 = dma.done.wait (%p1952_p3), [#allocation5], 5376   ;;  %p1953_p6 = pmov %p1952_p3 }
  0x65   : > { %v1688_v0 = vmov 0.0|0.0   ;;  %vm1689_vm0 = vmmov 0   ;;  %v1690_v1 = vmov 0.0   ;;  %v216_v2 = vld [vmem:[#allocation4] sm:$0xff]  ;;  %v217_v3 = vld [vmem:[#allocation4 + $0x8] sm:$0xff]  ;;  %v215_v8 = vld [vmem:[%s181_s8] sm:$0xff]  ;;  %v491_v60 = vlaneseq }
  0x66   : > { %1666 = vsyncadd (%p1953_p6), [#allocation5], 4294961920  ;;  %1429 = vmatprep.subr.bf16.mxu0 %v1688_v0  ;;  %1327 = vmatprep.mubr.msk.f32.mxu0 %vm1689_vm0, %v1690_v1  ;;  %v1430_v4 = vpack.c.bf16 %v217_v3, %v216_v2  ;;  %v299_v5 = vld [vmem:[#allocation4 + $0x20] sm:$0xff]  ;;  %v300_v6 = vld [vmem:[#allocation4 + $0x28] sm:$0xff]  ;;  %vm223_vm1 = vcmask 130048   ;;  %vm308_vm2 = vcmask 261120  }
  0x67   : > { %1432 = vmatprep.subr.bf16.mxu1 %v1688_v0  ;;  %1338 = vmatprep.mubr.msk.f32.mxu1 %vm1689_vm0, %v1690_v1  ;;  %v1433_v7 = vpack.c.bf16 %v300_v6, %v299_v5  ;;  %v301_v9 = vld [vmem:[#allocation4 + $0x30] sm:$0xff]  ;;  %v302_v10 = vld [vmem:[#allocation4 + $0x38] sm:$0xff]  ;;  %v384_v12 = vld [vmem:[#allocation4 + $0x40] sm:$0xff]  ;;  %v492_v61 = vshrl.u32 %v491_v60, 7  ;;  %p211_p7 = scmp.lt.s32.totalorder %s1730_s16, 3 }
  0x68   : > { %1431 = vmatpush3.bf16.msra.mxu0 %v1430_v4  ;;  %v1436_v11 = vpack.c.bf16 %v302_v10, %v301_v9  ;;  %v385_v13 = vld [vmem:[#allocation4 + $0x48] sm:$0xff]  ;;  %v1253_v15 = vld [vmem:[#allocation6] ss:$0 sm:$0xff]  ;;  %v386_v20 = vld [vmem:[#allocation4 + $0x50] sm:$0xff] }
  0x69   : > { %1434 = vmatpush3.bf16.msra.mxu1 %v1433_v7  ;;  %1438 = vmatprep.subr.bf16.mxu0 %v1688_v0  ;;  %v1439_v14 = vpack.c.bf16 %v385_v13, %v384_v12  ;;  %v387_v21 = vld [vmem:[#allocation4 + $0x58] sm:$0xff]  ;;  %v1255_v23 = vld [vmem:[#allocation6 + $0x1] ss:$0 sm:$0xff]  ;;  %v503_v29 = vld [vmem:[#allocation4 + $0x68] sm:$0xff]  ;;  %v1887_v63 = vsub.s32 0, %v492_v61  ;;  %s1959_s16 = smov (!%p211_p7, %s1730_s16), 3 }
  0x6a   : > { %1435 = vmatprep.subr.bf16.mxu1 %v1688_v0  ;;  %v1442_v22 = vpack.c.bf16 %v387_v21, %v386_v20  ;;  %v502_v28 = vld [vmem:[#allocation4 + $0x60] sm:$0xff]  ;;  %v504_v31 = vld [vmem:[#allocation4 + $0x70] sm:$0xff]  ;;  %v505_v32 = vld [vmem:[#allocation4 + $0x78] sm:$0xff]  ;;  %s1252_s17 = sshll.u32 %s1959_s16, 3 }
  0x6b   : > { %1328 = vmatmul.mubr.msk.f32.vlgmr.msra.gmra.mrb[0].mxu0 %vm223_vm1, %v215_v8  ;;  %v1445_v30 = vpack.c.bf16 %v503_v29, %v502_v28  ;;  %v1448_v33 = vpack.c.bf16 %v505_v32, %v504_v31  ;;  %v586_v34 = vld [vmem:[#allocation4 + $0x80] sm:$0xff]  ;;  %v587_v35 = vld [vmem:[#allocation4 + $0x88] sm:$0xff]  ;;  %v589_v12 = vld [vmem:[#allocation4 + $0x98] sm:$0xff]  ;;  %s214_s10 = scalar_lea.vmem %s1942_s3, %s1252_s17 }
  0x6c   : > { %1349 = vmatprep.mubr.msk.f32.mxu0 %vm1689_vm0, %v1690_v1  ;;  %1440 = vmatpush3.bf16.msra.mxu0 %v1439_v14  ;;  %v1451_v36 = vpack.c.bf16 %v587_v35, %v586_v34  ;;  %v1257_v37 = vld [vmem:[#allocation6 + $0x2] ss:$0 sm:$0xff]  ;;  %v467_v62 = vld [vmem:[#allocation6 + $0xa] sm:$0x1]  ;;  %v468_v4 = vld [vmem:[#allocation6 + $0xd] sm:$0x1] }
  0x6d   : > { %1437 = vmatpush3.bf16.msra.mxu1 %v1436_v11  ;;  %1441 = vmatprep.subr.bf16.mxu0 %v1688_v0  ;;  %v588_v11 = vld [vmem:[#allocation4 + $0x90] sm:$0xff]  ;;  %v670_v14 = vld [vmem:[#allocation4 + $0xa0] sm:$0xff]  ;;  %v789_v31 = vld [vmem:[#allocation4 + $0xc8] sm:$0xff] }
  0x6e   : > { %1444 = vmatprep.subr.bf16.mxu1 %v1688_v0  ;;  %v1454_v13 = vpack.c.bf16 %v589_v12, %v588_v11  ;;  %v791_v34 = vld [vmem:[#allocation4 + $0xd8] sm:$0xff]  ;;  %v874_v11 = vld [vmem:[#allocation4 + $0xf0] sm:$0xff] }
  0x6f   : > { %v875_v12 = vld [vmem:[#allocation4 + $0xf8] sm:$0xff] }
  0x70   : > { %1443 = vmatpush3.bf16.msra.mxu0 %v1442_v22  ;;  %v672_v22 = vld [vmem:[#allocation4 + $0xb0] sm:$0xff] }
  0x71   : > { %1450 = vmatprep.subr.bf16.mxu0 %v1688_v0 }
 0x13e   : > { %v293_v16 = vpop.f32.mrb[0].mxu0 }
 0x13f   : > { %v294_v17 = vadd.f32 %v1253_v15, %v293_v16  ;;  %v1329_v18 = vpop.f32.mrb[1].mxu0  ;;  %v671_v15 = vld [vmem:[#allocation4 + $0xa8] sm:$0xff] }
 0x140   : > { %v1457_v16 = vpack.c.bf16 %v671_v15, %v670_v14  ;;  %v956_v14 = vld [vmem:[#allocation4 + $0x100] sm:$0xff]  ;;  %v957_v15 = vld [vmem:[#allocation4 + $0x108] sm:$0xff] }
 0x141   : > { %v297_v19 = vmax.f32 %v294_v17, 0.0  ;;  %v1259_v17 = vld [vmem:[#allocation6 + $0x3] ss:$0 sm:$0xff] }
 0x143   : > { %1339 = vmatmul.mubr.msk.f32.vlgmr.msra.gmra.mrb[0].mxu1 %vm308_vm2, %v297_v19 }
 0x144   : > { %1360 = vmatprep.mubr.msk.f32.mxu1 %vm1689_vm0, %v1690_v1  ;;  %1446 = vmatpush3.bf16.msra.mxu1 %v1445_v30  ;;  %v788_v30 = vld [vmem:[#allocation4 + $0xc0] sm:$0xff] }
 0x145   : > { %1447 = vmatprep.subr.bf16.mxu1 %v1688_v0  ;;  %v1463_v32 = vpack.c.bf16 %v789_v31, %v788_v30  ;;  %v1074_v30 = vld [vmem:[#allocation4 + $0x120] sm:$0xff]  ;;  %v1075_v31 = vld [vmem:[#allocation4 + $0x128] sm:$0xff] }
 0x148   : > { %1449 = vmatpush3.bf16.msra.mxu1 %v1448_v33  ;;  %v790_v33 = vld [vmem:[#allocation4 + $0xd0] sm:$0xff] }
 0x149   : > { %1456 = vmatprep.subr.bf16.mxu1 %v1688_v0  ;;  %v1466_v35 = vpack.c.bf16 %v791_v34, %v790_v33  ;;  %v1076_v33 = vld [vmem:[#allocation4 + $0x130] sm:$0xff]  ;;  %v1077_v34 = vld [vmem:[#allocation4 + $0x138] sm:$0xff] }
 0x216   : > { %v378_v24 = vpop.f32.mrb[0].mxu1 }
 0x217   : > { %v379_v25 = vadd.f32 %v1255_v23, %v378_v24  ;;  %v1340_v26 = vpop.f32.mrb[1].mxu1  ;;  %v673_v23 = vld [vmem:[#allocation4 + $0xb8] sm:$0xff] }
 0x218   : > { %v1460_v24 = vpack.c.bf16 %v673_v23, %v672_v22  ;;  %v958_v22 = vld [vmem:[#allocation4 + $0x110] sm:$0xff]  ;;  %v959_v23 = vld [vmem:[#allocation4 + $0x118] sm:$0xff] }
 0x219   : > { %v382_v27 = vmax.f32 %v379_v25, 0.0  ;;  %v1261_v25 = vld [vmem:[#allocation6 + $0x4] ss:$0 sm:$0xff] }
 0x21b   : > { %1350 = vmatmul.mubr.msk.f32.vlgmr.msra.gmra.mrb[2].mxu0 %vm308_vm2, %v382_v27 }
 0x21c   : > { %1371 = vmatprep.mubr.msk.f32.mxu0 %vm1689_vm0, %v1690_v1  ;;  %1452 = vmatpush3.bf16.msra.mxu0 %v1451_v36  ;;  %v872_v36 = vld [vmem:[#allocation4 + $0xe0] sm:$0xff] }
 0x21d   : > { %1453 = vmatprep.subr.bf16.mxu0 %v1688_v0 }
 0x220   : > { %1455 = vmatpush3.bf16.msra.mxu0 %v1454_v13  ;;  %v1472_v13 = vpack.c.bf16 %v875_v12, %v874_v11 }
 0x221   : > { %1462 = vmatprep.subr.bf16.mxu0 %v1688_v0 }
 0x2ee   : > { %v462_v38 = vpop.f32.mrb[2].mxu0 }
 0x2ef   : > { %v463_v39 = vadd.f32 %v1257_v37, %v462_v38  ;;  %v1351_v40 = vpop.f32.mrb[3].mxu0  ;;  %v873_v37 = vld [vmem:[#allocation4 + $0xe8] sm:$0xff] }
 0x2f0   : > { %v1469_v38 = vpack.c.bf16 %v873_v37, %v872_v36 }
 0x2f1   : > { %v466_v41 = vmax.f32 %v463_v39, 0.0  ;;  %v1263_v39 = vld [vmem:[#allocation6 + $0x5] ss:$0 sm:$0xff] }
 0x2f3   : > { %v469_v42 = vrot.slane %v466_v41, 4  ;;  %v475_v43 = vmul.f32 %v466_v41, %v466_v41 }
 0x2f5   : > { %v470_v44 = vadd.f32 %v469_v42, %v466_v41  ;;  %v476_v45 = vrot.slane %v475_v43, 4 }
 0x2f7   : > { %v471_v46 = vrot.slane %v470_v44, 2  ;;  %v477_v47 = vadd.f32 %v476_v45, %v475_v43 }
 0x2f9   : > { %v472_v48 = vadd.f32 %v471_v46, %v470_v44  ;;  %v478_v49 = vrot.slane %v477_v47, 2 }
 0x2fb   : > { %v473_v50 = vrot.slane %v472_v48, 1  ;;  %v479_v51 = vadd.f32 %v478_v49, %v477_v47 }
 0x2fd   : > { %v474_v52 = vadd.f32 %v473_v50, %v472_v48  ;;  %v480_v53 = vrot.slane %v479_v51, 1 }
 0x2ff   : > { %v481_v54 = vadd.f32 %v480_v53, %v479_v51  ;;  %v482_v55 = vmul.f32 0.125, %v474_v52 }
 0x301   : > { %v483_v56 = vmul.f32 0.125, %v481_v54  ;;  %v484_v57 = vmul.f32 %v482_v55, %v482_v55 }
 0x303   : > { %v485_v58 = vsub.f32 %v483_v56, %v484_v57 }
 0x305   : > { %v486_v59 = vadd.f32 1e-05, %v485_v58 }
 0x307   : > { %1551 = vrsqrt.f32 %v486_v59 }
 0x311   : > { %v1552_v2 = vpop.eup %1551 }
 0x312   : > { %v488_v3 = vmul.f32 %v1552_v2, %v467_v62  ;;  %v753_v62 = vld [vmem:[#allocation6 + $0xb] sm:$0x1] }
 0x314   : > { %v489_v5 = vmul.f32 %v488_v3, %v482_v55  ;;  %v494_v6 = vrot.slane %v488_v3, %v1887_v63 }
 0x316   : > { %v490_v7 = vsub.f32 %v468_v4, %v489_v5  ;;  %v495_v8 = vmul.f32 %v494_v6, %v466_v41  ;;  %v754_v4 = vld [vmem:[#allocation6 + $0xe] sm:$0x1] }
 0x318   : > { %v499_v9 = vrot.slane %v490_v7, %v1887_v63 }
 0x31a   : > { %v500_v10 = vadd.f32 %v499_v9, %v495_v8 }
 0x31c   : > { %1361 = vmatmul.mubr.msk.f32.vlgmr.msra.gmra.mrb[2].mxu1 %vm308_vm2, %v500_v10 }
 0x31d   : > { %1382 = vmatprep.mubr.msk.f32.mxu1 %vm1689_vm0, %v1690_v1  ;;  %1458 = vmatpush3.bf16.msra.mxu1 %v1457_v16  ;;  %v1475_v16 = vpack.c.bf16 %v957_v15, %v956_v14 }
 0x31e   : > { %1459 = vmatprep.subr.bf16.mxu1 %v1688_v0 }
 0x321   : > { %1461 = vmatpush3.bf16.msra.mxu1 %v1460_v24  ;;  %v1478_v24 = vpack.c.bf16 %v959_v23, %v958_v22 }
 0x322   : > { %1468 = vmatprep.subr.bf16.mxu1 %v1688_v0 }
 0x3ef   : > { %v580_v18 = vpop.f32.mrb[2].mxu1 }
 0x3f0   : > { %v581_v19 = vadd.f32 %v1259_v17, %v580_v18  ;;  %v1362_v20 = vpop.f32.mrb[3].mxu1  ;;  %v1265_v17 = vld [vmem:[#allocation6 + $0x6] ss:$0 sm:$0xff] }
 0x3f2   : > { %v584_v21 = vmax.f32 %v581_v19, 0.0 }
 0x3f4   : > { %1372 = vmatmul.mubr.msk.f32.vlgmr.msra.gmra.mrb[4].mxu0 %vm308_vm2, %v584_v21 }
 0x3f5   : > { %1393 = vmatprep.mubr.msk.f32.mxu0 %vm1689_vm0, %v1690_v1  ;;  %1464 = vmatpush3.bf16.msra.mxu0 %v1463_v32  ;;  %v1481_v32 = vpack.c.bf16 %v1075_v31, %v1074_v30 }
 0x3f6   : > { %1465 = vmatprep.subr.bf16.mxu0 %v1688_v0 }
 0x3f9   : > { %1467 = vmatpush3.bf16.msra.mxu0 %v1466_v35  ;;  %v1269_v35 = vld [vmem:[#allocation6 + $0x8] ss:$0 sm:$0xff] }
 0x3fa   : > { %1474 = vmatprep.subr.bf16.mxu0 %v1688_v0 }
 0x4c7   : > { %v664_v26 = vpop.f32.mrb[4].mxu0 }
 0x4c8   : > { %v665_v27 = vadd.f32 %v1261_v25, %v664_v26  ;;  %v1373_v28 = vpop.f32.mrb[5].mxu0  ;;  %v1267_v25 = vld [vmem:[#allocation6 + $0x7] ss:$0 sm:$0xff] }
 0x4ca   : > { %v668_v29 = vmax.f32 %v665_v27, 0.0 }
 0x4cc   : > { %1383 = vmatmul.mubr.msk.f32.vlgmr.msra.gmra.mrb[4].mxu1 %vm308_vm2, %v668_v29 }
 0x4cd   : > { %1404 = vmatprep.mubr.msk.f32.mxu1 %vm1689_vm0, %v1690_v1  ;;  %1470 = vmatpush3.bf16.msra.mxu1 %v1469_v38 }
 0x4ce   : > { %1471 = vmatprep.subr.bf16.mxu1 %v1688_v0 }
 0x4d1   : > { %1473 = vmatpush3.bf16.msra.mxu1 %v1472_v13 }
 0x4d2   : > { %1480 = vmatprep.subr.bf16.mxu1 %v1688_v0 }
 0x59f   : > { %v748_v40 = vpop.f32.mrb[4].mxu1 }
 0x5a0   : > { %v749_v41 = vadd.f32 %v1263_v39, %v748_v40  ;;  %v1384_v42 = vpop.f32.mrb[5].mxu1 }
 0x5a2   : > { %v752_v43 = vmax.f32 %v749_v41, 0.0 }
 0x5a4   : > { %v755_v44 = vrot.slane %v752_v43, 4  ;;  %v761_v45 = vmul.f32 %v752_v43, %v752_v43 }
 0x5a6   : > { %v756_v46 = vadd.f32 %v755_v44, %v752_v43  ;;  %v762_v47 = vrot.slane %v761_v45, 4 }
 0x5a8   : > { %v757_v48 = vrot.slane %v756_v46, 2  ;;  %v763_v49 = vadd.f32 %v762_v47, %v761_v45 }
 0x5aa   : > { %v758_v50 = vadd.f32 %v757_v48, %v756_v46  ;;  %v764_v51 = vrot.slane %v763_v49, 2 }
 0x5ac   : > { %v759_v52 = vrot.slane %v758_v50, 1  ;;  %v765_v53 = vadd.f32 %v764_v51, %v763_v49 }
 0x5ae   : > { %v760_v54 = vadd.f32 %v759_v52, %v758_v50  ;;  %v766_v55 = vrot.slane %v765_v53, 1 }
 0x5b0   : > { %v767_v56 = vadd.f32 %v766_v55, %v765_v53  ;;  %v768_v57 = vmul.f32 0.125, %v760_v54 }
 0x5b2   : > { %v769_v58 = vmul.f32 0.125, %v767_v56  ;;  %v770_v59 = vmul.f32 %v768_v57, %v768_v57 }
 0x5b4   : > { %v771_v60 = vsub.f32 %v769_v58, %v770_v59 }
 0x5b6   : > { %v772_v61 = vadd.f32 1e-05, %v771_v60  ;;  %v1040_v60 = vld [vmem:[#allocation6 + $0xf] sm:$0x1] }
 0x5b8   : > { %1553 = vrsqrt.f32 %v772_v61 }
 0x5c2   : > { %v1554_v2 = vpop.eup %1553 }
 0x5c3   : > { %v774_v3 = vmul.f32 %v1554_v2, %v753_v62 }
 0x5c5   : > { %v775_v5 = vmul.f32 %v774_v3, %v768_v57  ;;  %v780_v6 = vrot.slane %v774_v3, %v1887_v63  ;;  %v1039_v57 = vld [vmem:[#allocation6 + $0xc] sm:$0x1] }
 0x5c7   : > { %v776_v7 = vsub.f32 %v754_v4, %v775_v5  ;;  %v781_v8 = vmul.f32 %v780_v6, %v752_v43  ;;  %v1271_v6 = vld [vmem:[#allocation6 + $0x9] ss:$0 sm:$0xff] }
 0x5c9   : > { %v785_v9 = vrot.slane %v776_v7, %v1887_v63 }
 0x5cb   : > { %v786_v10 = vadd.f32 %v785_v9, %v781_v8 }
 0x5cd   : > { %1394 = vmatmul.mubr.msk.f32.vlgmr.msra.gmra.mrb[6].mxu0 %vm308_vm2, %v786_v10 }
 0x5ce   : > { %1415 = vmatprep.mubr.msk.f32.mxu0 %vm1689_vm0, %v1690_v1  ;;  %1476 = vmatpush3.bf16.msra.mxu0 %v1475_v16 }
 0x5cf   : > { %1477 = vmatprep.subr.bf16.mxu0 %v1688_v0 }
 0x5d2   : > { %1479 = vmatpush3.bf16.msra.mxu0 %v1478_v24 }
 0x6a0   : > { %v866_v18 = vpop.f32.mrb[6].mxu0 }
 0x6a1   : > { %v867_v19 = vadd.f32 %v1265_v17, %v866_v18  ;;  %v1395_v20 = vpop.f32.mrb[7].mxu0 }
 0x6a3   : > { %v870_v21 = vmax.f32 %v867_v19, 0.0 }
 0x6a5   : > { %1405 = vmatmul.mubr.msk.f32.vlgmr.msra.gmra.mrb[6].mxu1 %vm308_vm2, %v870_v21 }
 0x6a6   : > { %1426 = vmatprep.mubr.msk.f32.mxu1 %vm1689_vm0, %v1690_v1  ;;  %1482 = vmatpush3.bf16.msra.mxu1 %v1481_v32  ;;  %v1484_v1 = vpack.c.bf16 %v1077_v34, %v1076_v33 }
 0x6a7   : > { %1483 = vmatprep.subr.bf16.mxu1 %v1688_v0 }
 0x6aa   : > { %1485 = vmatpush3.bf16.msra.mxu1 %v1484_v1 }
 0x778   : > { %v950_v26 = vpop.f32.mrb[6].mxu1 }
 0x779   : > { %v951_v27 = vadd.f32 %v1267_v25, %v950_v26  ;;  %v1406_v28 = vpop.f32.mrb[7].mxu1 }
 0x77b   : > { %v954_v29 = vmax.f32 %v951_v27, 0.0 }
 0x77d   : > { %1416 = vmatmul.mubr.msk.f32.vlgmr.msra.gmra.mrb[8].mxu0 %vm308_vm2, %v954_v29 }
 0x850   : > { %v1034_v36 = vpop.f32.mrb[8].mxu0 }
 0x851   : > { %v1035_v37 = vadd.f32 %v1269_v35, %v1034_v36  ;;  %v1417_v38 = vpop.f32.mrb[9].mxu0 }
 0x853   : > { %v1038_v39 = vmax.f32 %v1035_v37, 0.0 }
 0x855   : > { %v1041_v40 = vrot.slane %v1038_v39, 4  ;;  %v1047_v41 = vmul.f32 %v1038_v39, %v1038_v39 }
 0x857   : > { %v1042_v42 = vadd.f32 %v1041_v40, %v1038_v39  ;;  %v1048_v43 = vrot.slane %v1047_v41, 4 }
 0x859   : > { %v1043_v44 = vrot.slane %v1042_v42, 2  ;;  %v1049_v45 = vadd.f32 %v1048_v43, %v1047_v41 }
 0x85b   : > { %v1044_v46 = vadd.f32 %v1043_v44, %v1042_v42  ;;  %v1050_v47 = vrot.slane %v1049_v45, 2 }
 0x85d   : > { %v1045_v48 = vrot.slane %v1044_v46, 1  ;;  %v1051_v49 = vadd.f32 %v1050_v47, %v1049_v45 }
 0x85f   : > { %v1046_v0 = vadd.f32 %v1045_v48, %v1044_v46  ;;  %v1052_v50 = vrot.slane %v1051_v49, 1 }
 0x861   : > { %v1053_v51 = vadd.f32 %v1052_v50, %v1051_v49  ;;  %v1054_v52 = vmul.f32 0.125, %v1046_v0 }
 0x863   : > { %v1055_v53 = vmul.f32 0.125, %v1053_v51  ;;  %v1056_v54 = vmul.f32 %v1054_v52, %v1054_v52 }
 0x865   : > { %v1057_v55 = vsub.f32 %v1055_v53, %v1056_v54 }
 0x867   : > { %v1058_v56 = vadd.f32 1e-05, %v1057_v55 }
 0x869   : > { %1555 = vrsqrt.f32 %v1058_v56 }
 0x873   : > { %v1556_v58 = vpop.eup %1555 }
 0x874   : > { %v1060_v59 = vmul.f32 %v1556_v58, %v1039_v57 }
 0x876   : > { %v1061_v61 = vmul.f32 %v1060_v59, %v1054_v52  ;;  %v1066_v62 = vrot.slane %v1060_v59, %v1887_v63 }
 0x878   : > { %v1062_v2 = vsub.f32 %v1040_v60, %v1061_v61  ;;  %v1067_v3 = vmul.f32 %v1066_v62, %v1038_v39 }
 0x87a   : > { %v1071_v4 = vrot.slane %v1062_v2, %v1887_v63 }
 0x87c   : > { %v1072_v5 = vadd.f32 %v1071_v4, %v1067_v3 }
 0x87e   : > { %1427 = vmatmul.mubr.msk.f32.vlgmr.msra.gmra.mrb[8].mxu1 %vm308_vm2, %v1072_v5 }
 0x951   : > { %v1152_v7 = vpop.f32.mrb[8].mxu1 }
 0x952   : > { %v1153_v8 = vadd.f32 %v1271_v6, %v1152_v7  ;;  %v1428_v9 = vpop.f32.mrb[9].mxu1 }
 0x954   : > { %1156 = vst [vmem:[%s214_s10] sm:$0xff] %v1153_v8 }
 0x955 PF: > { %p14_p9 = scmp.ge.s32.totalorder %s1804_s27, 6   ;;  %s1954_s12 = smov %s1673_s13 }
 0x956   : > { %s1955_s13 = smov %s1677_s14  ;;  %s1956_s14 = smov %s1815_s30 }
 0x957   : > { %s1957_s15 = smov %s1804_s27  ;;  %16 = sbr.rel (!%p14_p9) target bundleno = 4 (0x4), region = 89 }
 0x95e   :  { %1176 = vsyncpa [#allocation3], 1 }
 0x95f   :  { %1178 = vsyncpa [#allocation3 + $0x1], 1 }
 0x960   :  { %1179 = vsyncpa [#allocation5], 1 }

</bundles_post_ra>
